<compile_context>
chip_gen: v7x
topology: tpu7x:2x2x1
jax: 0.10.0
libtpu: 0.0.40
codegen_flags: <defaults>
</compile_context>

<pallas_src>
import functools

import jax
import jax.numpy as jnp
import numpy as np
from jax import lax
from jax.experimental import pallas as pl
from jax.experimental.pallas import tpu as pltpu


def _round_up(n, m):
    return ((n + m - 1) // m) * m


def _gated_unit_kernel(x_ref, h_ref, w_ref, z_ref, a_ref, b_ref,
                       carry_ref, op_ref, *, k_taps, c_res, c_cin):
    """One (batch element, time tile) step.

    x_ref  : (C_res, T_TILE)  current time tile of x
    h_ref  : (C_cin, T_TILE)  conditioning features, same time tile
    w_ref  : (2G, K*C_res + C_cin + 1) fused weight
             rows [0,G)       -> y = causal_conv(x) + bias        (feeds z)
             rows [G,G+G/2)   -> a = y[:G/2] + wc[:G/2] @ h
             rows [G+G/2,2G)  -> b = y[G/2:] + wc[:G/2] @ h
             last column = bias (multiplied by a constant ones operand row)
    carry_ref : (C_res, K-1) VMEM scratch = last K-1 x columns of the previous
                time tile of the SAME batch element (causal halo).
    op_ref    : (K*C_res + C_cin + 1, T_TILE) persistent operand scratch.

    NOTE (correctness): the halo carry and the persistent ones row require the
    time axis (grid axis 1) to be the innermost, *sequentially executed*
    ("arbitrary") grid axis, and rely on per-core scratch when the batch axis
    is sharded across TensorCores.  Do not mark axis 1 "parallel" or swap the
    grid order.
    """
    t = pl.program_id(1)
    tt = x_ref.shape[-1]
    km1 = k_taps - 1
    g = z_ref.shape[0]
    half = a_ref.shape[0]
    ones_row = k_taps * c_res + c_cin

    @pl.when(t == 0)
    def _():
        # Causal left padding (zeros) for the first tile of this batch element
        # and the constant ones row that folds the conv bias into the matmul.
        carry_ref[...] = jnp.zeros_like(carry_ref)
        op_ref[pl.ds(ones_row, 1), :] = jnp.ones((1, tt), op_ref.dtype)

    x_t = x_ref[...]                                    # (C_res, T_TILE)
    carry = carry_ref[...]                              # (C_res, K-1)

    # im2col written straight into the persistent operand scratch (no
    # functional concatenates / temporaries): tap k holds x[:, t-(K-1)+k]; the
    # first K-1-k columns of tap k come from the previous tile's tail (carry).
    for k in range(k_taps):                             # K is small and static
        s = km1 - k                                     # causal right shift
        rows = pl.ds(k * c_res, c_res)
        if s == 0:
            op_ref[rows, :] = x_t
        else:
            op_ref[rows, pl.ds(s, tt - s)] = x_t[:, :tt - s]
            op_ref[rows, pl.ds(0, s)] = carry[:, k:]
    op_ref[pl.ds(k_taps * c_res, c_cin), :] = h_ref[...]
    carry_ref[...] = x_t[:, tt - km1:]                  # halo for the next tile

    # ONE MXU push: all K causal-conv taps + halved 1x1 conditioning + bias.
    acc = jnp.dot(w_ref[...], op_ref[...],
                  preferred_element_type=jnp.float32)   # (2G, T_TILE) f32

    y = acc[:g]                                         # conv + bias
    # tanh(y)*sigmoid(y) == (1 - e)/(1 + e*e) with e = exp(-y): one EUP exp +
    # one approx reciprocal.  Clamp avoids e*e overflow for very negative y
    # (error there < 1e-13, negligible).
    e = jnp.exp(-jnp.maximum(y, -30.0))
    z_ref[...] = ((1.0 - e) * pl.reciprocal(1.0 + e * e,
                                            approx=True)).astype(z_ref.dtype)
    a_ref[...] = acc[g:g + half].astype(a_ref.dtype)
    b_ref[...] = acc[g + half:].astype(b_ref.dtype)


def residual_conv1d_gated_unit(x, h, conv_w, conv_b, wc, *, t_tile=8192,
                               out_dtype=jnp.bfloat16,
                               compute_dtype=jnp.bfloat16):
    """x: (B, C_res, T), h: (B, C_cin, T), conv_w: (G, C_res, K), conv_b: (G,),
    wc: (G, C_cin).  Returns (z, a, b): z (B, G, T), a/b (B, G//2, T).

    Inputs are cast to `compute_dtype` (no-op if the caller already supplies
    bf16 activations); accumulation is f32.
    """
    B, c_res, T = x.shape
    G, _, K = conv_w.shape
    c_cin = wc.shape[1]
    half = G // 2
    assert 2 <= K <= 129, "kernel assumes 2 <= kernel_size <= 129"
    assert wc.shape[0] == G and h.shape == (B, c_cin, T)
    # TODO(synk): dilation > 1 and global (gin) conditioning are not implemented.

    in_isz = jnp.dtype(compute_dtype).itemsize
    out_isz = jnp.dtype(out_dtype).itemsize
    op_rows = K * c_res + c_cin + 1        # K taps + conditioning + ones (bias)

    # --- lane-dense time tile, sized against a conservative VMEM budget ------
    def vmem_need(tt):
        io_blocks = 2 * ((c_res + c_cin) * in_isz + 2 * G * out_isz) * tt  # 2x buffered
        scratch = op_rows * tt * in_isz + c_res * (K - 1) * in_isz
        temps = 3 * (2 * G) * tt * 4       # f32 accumulator + elementwise temps
        return io_blocks + scratch + temps

    t_tile = max(128, _round_up(min(int(t_tile), _round_up(T, 128)), 128))
    budget = 40 * 1024 * 1024              # leaves headroom on v7x's 64 MiB VMEM
    while t_tile > 128 and vmem_need(t_tile) > budget:
        t_tile = max(128, _round_up(t_tile // 2, 128))
    n_t = pl.cdiv(T, t_tile)               # ragged tail handled by Pallas masking
    vmem_limit = int(min(max(vmem_need(t_tile) + (8 << 20), 32 << 20), 64 << 20))

    # --- bf16 activations (no-op if already 16-bit) ---------------------------
    x = x.astype(compute_dtype)
    h = h.astype(compute_dtype)

    # Fused weight: rows [y ; a ; b], columns [K conv taps | wc[:G//2] | bias].
    # (For large C_res/G, split conv and conditioning matmuls instead of
    #  carrying the zero block — at small channel counts the MXU idles anyway.)
    w_flat = jnp.transpose(conv_w, (0, 2, 1)).reshape(G, K * c_res)
    zeros_c = jnp.zeros((G, c_cin), conv_w.dtype)
    wc_half = wc[:half]
    w_fused = jnp.concatenate([
        jnp.concatenate([w_flat, zeros_c, conv_b[:, None]], axis=1),
        jnp.concatenate([w_flat[:half], wc_half, conv_b[:half, None]], axis=1),
        jnp.concatenate([w_flat[half:], wc_half, conv_b[half:, None]], axis=1),
    ], axis=0).astype(compute_dtype)                  # (2G, op_rows)

    cost = pl.CostEstimate(
        flops=2 * B * T * (2 * G) * op_rows,
        transcendentals=2 * B * T * G,
        bytes_accessed=((c_res + c_cin) * B * T * in_isz
                        + int(w_fused.size) * in_isz
                        + 2 * G * B * T * out_isz))

    kernel = functools.partial(_gated_unit_kernel, k_taps=K,
                               c_res=c_res, c_cin=c_cin)

    # TODO(synk): for v7x with B == 1 (or odd B), split the time axis into
    # per-core contiguous ranges (seeding each range's halo) to keep both
    # TensorCores busy; with B >= 2 the parallel batch axis already does.
    z, a, b = pl.pallas_call(
        kernel,
        out_shape=(jax.ShapeDtypeStruct((B, G, T), out_dtype),
                   jax.ShapeDtypeStruct((B, half, T), out_dtype),
                   jax.ShapeDtypeStruct((B, half, T), out_dtype)),
        grid=(B, n_t),
        in_specs=[
            pl.BlockSpec((None, c_res, t_tile), lambda bi, ti: (bi, 0, ti)),
            pl.BlockSpec((None, c_cin, t_tile), lambda bi, ti: (bi, 0, ti)),
            pl.BlockSpec((2 * G, op_rows), lambda bi, ti: (0, 0)),
        ],
        out_specs=(
            pl.BlockSpec((None, G, t_tile), lambda bi, ti: (bi, 0, ti)),
            pl.BlockSpec((None, half, t_tile), lambda bi, ti: (bi, 0, ti)),
            pl.BlockSpec((None, half, t_tile), lambda bi, ti: (bi, 0, ti)),
        ),
        scratch_shapes=[
            pltpu.VMEM((c_res, K - 1), compute_dtype),     # causal halo carry
            pltpu.VMEM((op_rows, t_tile), compute_dtype),  # fused matmul operand
        ],
        compiler_params=pltpu.CompilerParams(
            # time axis carries the halo scratch -> must stay "arbitrary";
            # batch axis is independent -> "parallel" (megacore sharding).
            dimension_semantics=("parallel", "arbitrary"),
            vmem_limit_bytes=vmem_limit),
        cost_estimate=cost,
    )(x, h, w_fused)
    return z, a, b


def _reference(x, h, conv_w, conv_b, wc):
    G, _, K = conv_w.shape
    half = G // 2
    y = lax.conv_general_dilated(
        x, conv_w, window_strides=(1,), padding=[(K - 1, 0)],
        dimension_numbers=("NCH", "OIH", "NCH"))
    y = y + conv_b[None, :, None]
    ha = jnp.einsum("gc,bct->bgt", wc[:half], h)
    a = y[:, :half] + ha
    b = y[:, half:] + ha
    z = jnp.tanh(y) * jax.nn.sigmoid(y)
    return z, a, b


if __name__ == "__main__":
    B = 2
    residual_channels = 8
    gate_channels = 16
    kernel_size = 3
    cin_channels = 8
    T = 160   # not 128-aligned: exercises the cross-tile causal carry AND the
              # masked partial last time tile (no wrapper-side padding).

    key = jax.random.PRNGKey(0)
    k1, k2, k3, k4, k5 = jax.random.split(key, 5)

    conv_w = 0.1 * jax.random.normal(
        k1, (gate_channels, residual_channels, kernel_size), jnp.float32)
    conv_b = 0.1 * jax.random.normal(k2, (gate_channels,), jnp.float32)
    wc = 0.1 * jax.random.normal(
        k3, (gate_channels, cin_channels), jnp.float32)   # 1x1 cond. conv weight

    x = jax.random.normal(k4, (B, residual_channels, T), jnp.float32)
    h = jax.random.normal(k5, (B, cin_channels, T), jnp.float32)

    # Reference on bf16-rounded operands (the kernel computes bf16 x bf16 with
    # f32 accumulation), so the comparison isolates kernel error from input
    # quantization.
    rnd = lambda v: v.astype(jnp.bfloat16).astype(jnp.float32)
    z_ref, a_ref, b_ref = _reference(rnd(x), rnd(h), rnd(conv_w),
                                     rnd(conv_b), rnd(wc))

    # Run both code paths: multi-tile (cross-tile carry) and a single ragged tile.
    for tile in (128, None):
        kwargs = {} if tile is None else {"t_tile": tile}
        z, a, b = residual_conv1d_gated_unit(x, h, conv_w, conv_b, wc, **kwargs)
        jax.block_until_ready((z, a, b))
        np.testing.assert_allclose(np.asarray(z.astype(jnp.float32)),
                                   np.asarray(z_ref), atol=2e-2, rtol=2e-2)
        np.testing.assert_allclose(np.asarray(a.astype(jnp.float32)),
                                   np.asarray(a_ref), atol=2e-2, rtol=2e-2)
        np.testing.assert_allclose(np.asarray(b.astype(jnp.float32)),
                                   np.asarray(b_ref), atol=2e-2, rtol=2e-2)

    print("KERNEL_OK")
</pallas_src>

<mosaic_0001>
module attributes {stable_mosaic.version = 11 : i64} {
  func.func @_gated_unit_kernel(%arg0: i32, %arg1: i32, %arg2: memref<1x8x128xbf16, #tpu.memory_space<vmem>>, %arg3: memref<1x8x128xbf16, #tpu.memory_space<vmem>>, %arg4: memref<32x33xbf16, #tpu.memory_space<vmem>>, %arg5: memref<1x16x128xbf16, #tpu.memory_space<vmem>>, %arg6: memref<1x8x128xbf16, #tpu.memory_space<vmem>>, %arg7: memref<1x8x128xbf16, #tpu.memory_space<vmem>>, %arg8: memref<8x2xbf16, #tpu.memory_space<vmem>>, %arg9: memref<33x128xbf16, #tpu.memory_space<vmem>>) attributes {dimension_semantics = [#tpu.dimension_semantics<parallel>, #tpu.dimension_semantics<arbitrary>], iteration_bounds = array<i64: 2, 2>, scalar_prefetch = 0 : i64, scratch_operands = 2 : i64, tpu.core_type = #tpu.core_type<tc>, window_params = [{transform_indices = @transform_0, window_bounds = array<i64: 1, 8, 128>}, {transform_indices = @transform_1, window_bounds = array<i64: 1, 8, 128>}, {pipeline_mode = #tpu.pipeline_mode<synchronous>, transform_indices = @transform_2, window_bounds = array<i64: 32, 33>}, {transform_indices = @transform_3, window_bounds = array<i64: 1, 16, 128>}, {transform_indices = @transform_4, window_bounds = array<i64: 1, 8, 128>}, {transform_indices = @transform_5, window_bounds = array<i64: 1, 8, 128>}]} {
    %c0_i32 = arith.constant 0 : i32
    %0 = arith.cmpi eq, %arg1, %c0_i32 : i32
    %1 = arith.extui %0 : i1 to i32
    %c0_i32_0 = arith.constant 0 : i32
    %2 = arith.cmpi ne, %1, %c0_i32_0 : i32
    scf.if %2 {
      %cst_34 = arith.constant 0.000000e+00 : bf16
      %49 = vector.broadcast %cst_34 : bf16 to vector<8x2xbf16>
      %c0_35 = arith.constant 0 : index
      %c0_36 = arith.constant 0 : index
      %50 = vector.load %arg8[%c0_35, %c0_36] : memref<8x2xbf16, #tpu.memory_space<vmem>>, vector<8x2xbf16>
      tpu.vector_store %arg8[%c0_35, %c0_36], %49 {strides = array<i32>} : memref<8x2xbf16, #tpu.memory_space<vmem>>, vector<8x2xbf16>,
      %cst_37 = arith.constant 1.000000e+00 : bf16
      %51 = vector.broadcast %cst_37 : bf16 to vector<1x128xbf16>
      %c32 = arith.constant 32 : index
      %c0_38 = arith.constant 0 : index
      %52 = vector.load %arg9[%c32, %c0_38] : memref<33x128xbf16, #tpu.memory_space<vmem>>, vector<1x128xbf16>
      tpu.vector_store %arg9[%c32, %c0_38], %51 {strides = array<i32>} : memref<33x128xbf16, #tpu.memory_space<vmem>>, vector<1x128xbf16>,
    } else {
    }
    %c0 = arith.constant 0 : index
    %c0_1 = arith.constant 0 : index
    %c0_2 = arith.constant 0 : index
    %3 = vector.load %arg2[%c0, %c0_1, %c0_2] : memref<1x8x128xbf16, #tpu.memory_space<vmem>>, vector<1x8x128xbf16>
    %4 = vector.shape_cast %3 : vector<1x8x128xbf16> to vector<8x128xbf16>
    %c0_3 = arith.constant 0 : index
    %c0_4 = arith.constant 0 : index
    %5 = vector.load %arg8[%c0_3, %c0_4] : memref<8x2xbf16, #tpu.memory_space<vmem>>, vector<8x2xbf16>
    %6 = vector.extract_strided_slice %4 {offsets = [0, 0], sizes = [8, 126], strides = [1, 1]} : vector<8x128xbf16> to vector<8x126xbf16>
    %c0_5 = arith.constant 0 : index
    %c2 = arith.constant 2 : index
    %7 = vector.load %arg9[%c0_5, %c2] : memref<33x128xbf16, #tpu.memory_space<vmem>>, vector<8x126xbf16>
    tpu.vector_store %arg9[%c0_5, %c2], %6 {strides = array<i32>} : memref<33x128xbf16, #tpu.memory_space<vmem>>, vector<8x126xbf16>,
    %c0_6 = arith.constant 0 : index
    %c0_7 = arith.constant 0 : index
    %8 = vector.load %arg9[%c0_6, %c0_7] : memref<33x128xbf16, #tpu.memory_space<vmem>>, vector<8x2xbf16>
    tpu.vector_store %arg9[%c0_6, %c0_7], %5 {strides = array<i32>} : memref<33x128xbf16, #tpu.memory_space<vmem>>, vector<8x2xbf16>,
    %9 = vector.extract_strided_slice %4 {offsets = [0, 0], sizes = [8, 127], strides = [1, 1]} : vector<8x128xbf16> to vector<8x127xbf16>
    %c8 = arith.constant 8 : index
    %c1 = arith.constant 1 : index
    %10 = vector.load %arg9[%c8, %c1] : memref<33x128xbf16, #tpu.memory_space<vmem>>, vector<8x127xbf16>
    tpu.vector_store %arg9[%c8, %c1], %9 {strides = array<i32>} : memref<33x128xbf16, #tpu.memory_space<vmem>>, vector<8x127xbf16>,
    %11 = vector.extract_strided_slice %5 {offsets = [0, 1], sizes = [8, 1], strides = [1, 1]} : vector<8x2xbf16> to vector<8x1xbf16>
    %c8_8 = arith.constant 8 : index
    %c0_9 = arith.constant 0 : index
    %12 = vector.load %arg9[%c8_8, %c0_9] : memref<33x128xbf16, #tpu.memory_space<vmem>>, vector<8x1xbf16>
    tpu.vector_store %arg9[%c8_8, %c0_9], %11 {strides = array<i32>} : memref<33x128xbf16, #tpu.memory_space<vmem>>, vector<8x1xbf16>,
    %c16 = arith.constant 16 : index
    %c0_10 = arith.constant 0 : index
    %13 = vector.load %arg9[%c16, %c0_10] : memref<33x128xbf16, #tpu.memory_space<vmem>>, vector<8x128xbf16>
    tpu.vector_store %arg9[%c16, %c0_10], %4 {strides = array<i32>} : memref<33x128xbf16, #tpu.memory_space<vmem>>, vector<8x128xbf16>,
    %c0_11 = arith.constant 0 : index
    %c0_12 = arith.constant 0 : index
    %c0_13 = arith.constant 0 : index
    %14 = vector.load %arg3[%c0_11, %c0_12, %c0_13] : memref<1x8x128xbf16, #tpu.memory_space<vmem>>, vector<1x8x128xbf16>
    %15 = vector.shape_cast %14 : vector<1x8x128xbf16> to vector<8x128xbf16>
    %c24 = arith.constant 24 : index
    %c0_14 = arith.constant 0 : index
    %16 = vector.load %arg9[%c24, %c0_14] : memref<33x128xbf16, #tpu.memory_space<vmem>>, vector<8x128xbf16>
    tpu.vector_store %arg9[%c24, %c0_14], %15 {strides = array<i32>} : memref<33x128xbf16, #tpu.memory_space<vmem>>, vector<8x128xbf16>,
    %17 = vector.extract_strided_slice %4 {offsets = [0, 126], sizes = [8, 2], strides = [1, 1]} : vector<8x128xbf16> to vector<8x2xbf16>
    %c0_15 = arith.constant 0 : index
    %c0_16 = arith.constant 0 : index
    %18 = vector.load %arg8[%c0_15, %c0_16] : memref<8x2xbf16, #tpu.memory_space<vmem>>, vector<8x2xbf16>
    tpu.vector_store %arg8[%c0_15, %c0_16], %17 {strides = array<i32>} : memref<8x2xbf16, #tpu.memory_space<vmem>>, vector<8x2xbf16>,
    %c0_17 = arith.constant 0 : index
    %c0_18 = arith.constant 0 : index
    %19 = vector.load %arg4[%c0_17, %c0_18] : memref<32x33xbf16, #tpu.memory_space<vmem>>, vector<32x33xbf16>
    %c0_19 = arith.constant 0 : index
    %c0_20 = arith.constant 0 : index
    %20 = vector.load %arg9[%c0_19, %c0_20] : memref<33x128xbf16, #tpu.memory_space<vmem>>, vector<33x128xbf16>
    %cst = arith.constant dense<0.000000e+00> : vector<32x128xf32>
    %21 = tpu.matmul %19, %20, %cst {dimension_numbers = #tpu.dot_dimension_numbers<[1], [0], [0], [1], [0, 0, 1, 1], [], []>} : vector<32x33xbf16>, vector<33x128xbf16>, vector<32x128xf32> -> vector<32x128xf32>
    %22 = vector.extract_strided_slice %21 {offsets = [0, 0], sizes = [16, 128], strides = [1, 1]} : vector<32x128xf32> to vector<16x128xf32>
    %cst_21 = arith.constant -3.000000e+01 : f32
    %23 = vector.broadcast %cst_21 : f32 to vector<16x128xf32>
    %24 = arith.maximumf %22, %23 : vector<16x128xf32>
    %cst_22 = arith.constant 0.000000e+00 : f32
    %25 = vector.broadcast %cst_22 : f32 to vector<16x128xf32>
    %26 = arith.subf %25, %24 : vector<16x128xf32>
    %27 = math.exp %26 : vector<16x128xf32>
    %cst_23 = arith.constant 1.000000e+00 : f32
    %28 = vector.broadcast %cst_23 : f32 to vector<16x128xf32>
    %29 = arith.subf %28, %27 : vector<16x128xf32>
    %30 = arith.mulf %27, %27 : vector<16x128xf32>
    %cst_24 = arith.constant 1.000000e+00 : f32
    %31 = vector.broadcast %cst_24 : f32 to vector<16x128xf32>
    %32 = arith.addf %31, %30 : vector<16x128xf32>
    %33 = tpu.reciprocal %32 {approx = true} : vector<16x128xf32> -> vector<16x128xf32>
    %34 = arith.mulf %29, %33 : vector<16x128xf32>
    %35 = arith.truncf %34 : vector<16x128xf32> to vector<16x128xbf16>
    %c0_25 = arith.constant 0 : index
    %c0_26 = arith.constant 0 : index
    %c0_27 = arith.constant 0 : index
    %36 = vector.load %arg5[%c0_25, %c0_26, %c0_27] : memref<1x16x128xbf16, #tpu.memory_space<vmem>>, vector<1x16x128xbf16>
    %37 = vector.shape_cast %36 : vector<1x16x128xbf16> to vector<16x128xbf16>
    %38 = vector.shape_cast %35 : vector<16x128xbf16> to vector<1x16x128xbf16>
    tpu.vector_store %arg5[%c0_25, %c0_26, %c0_27], %38 {strides = array<i32>} : memref<1x16x128xbf16, #tpu.memory_space<vmem>>, vector<1x16x128xbf16>,
    %39 = vector.extract_strided_slice %21 {offsets = [16, 0], sizes = [8, 128], strides = [1, 1]} : vector<32x128xf32> to vector<8x128xf32>
    %40 = arith.truncf %39 : vector<8x128xf32> to vector<8x128xbf16>
    %c0_28 = arith.constant 0 : index
    %c0_29 = arith.constant 0 : index
    %c0_30 = arith.constant 0 : index
    %41 = vector.load %arg6[%c0_28, %c0_29, %c0_30] : memref<1x8x128xbf16, #tpu.memory_space<vmem>>, vector<1x8x128xbf16>
    %42 = vector.shape_cast %41 : vector<1x8x128xbf16> to vector<8x128xbf16>
    %43 = vector.shape_cast %40 : vector<8x128xbf16> to vector<1x8x128xbf16>
    tpu.vector_store %arg6[%c0_28, %c0_29, %c0_30], %43 {strides = array<i32>} : memref<1x8x128xbf16, #tpu.memory_space<vmem>>, vector<1x8x128xbf16>,
    %44 = vector.extract_strided_slice %21 {offsets = [24, 0], sizes = [8, 128], strides = [1, 1]} : vector<32x128xf32> to vector<8x128xf32>
    %45 = arith.truncf %44 : vector<8x128xf32> to vector<8x128xbf16>
    %c0_31 = arith.constant 0 : index
    %c0_32 = arith.constant 0 : index
    %c0_33 = arith.constant 0 : index
    %46 = vector.load %arg7[%c0_31, %c0_32, %c0_33] : memref<1x8x128xbf16, #tpu.memory_space<vmem>>, vector<1x8x128xbf16>
    %47 = vector.shape_cast %46 : vector<1x8x128xbf16> to vector<8x128xbf16>
    %48 = vector.shape_cast %45 : vector<8x128xbf16> to vector<1x8x128xbf16>
    tpu.vector_store %arg7[%c0_31, %c0_32, %c0_33], %48 {strides = array<i32>} : memref<1x8x128xbf16, #tpu.memory_space<vmem>>, vector<1x8x128xbf16>,
    return
  }
  func.func @transform_0(%arg0: i32, %arg1: i32) -> (i32, i32, i32) {
    %c0_i32 = arith.constant 0 : i32
    %c0_i32_0 = arith.constant 0 : i32
    return %arg0, %c0_i32, %arg1 : i32, i32, i32
  }
  func.func @transform_1(%arg0: i32, %arg1: i32) -> (i32, i32, i32) {
    %c0_i32 = arith.constant 0 : i32
    %c0_i32_0 = arith.constant 0 : i32
    return %arg0, %c0_i32, %arg1 : i32, i32, i32
  }
  func.func @transform_2(%arg0: i32, %arg1: i32) -> (i32, i32) {
    %c0_i32 = arith.constant 0 : i32
    %c0_i32_0 = arith.constant 0 : i32
    %c0_i32_1 = arith.constant 0 : i32
    return %c0_i32, %c0_i32_0 : i32, i32
  }
  func.func @transform_3(%arg0: i32, %arg1: i32) -> (i32, i32, i32) {
    %c0_i32 = arith.constant 0 : i32
    %c0_i32_0 = arith.constant 0 : i32
    return %arg0, %c0_i32, %arg1 : i32, i32, i32
  }
  func.func @transform_4(%arg0: i32, %arg1: i32) -> (i32, i32, i32) {
    %c0_i32 = arith.constant 0 : i32
    %c0_i32_0 = arith.constant 0 : i32
    return %arg0, %c0_i32, %arg1 : i32, i32, i32
  }
  func.func @transform_5(%arg0: i32, %arg1: i32) -> (i32, i32, i32) {
    %c0_i32 = arith.constant 0 : i32
    %c0_i32_0 = arith.constant 0 : i32
    return %arg0, %c0_i32, %arg1 : i32, i32, i32
  }
}

</mosaic_0001>

<bundles_post_ra>
// kernel: tpu_custom_call.1
= control target key start
LH: loop header
LB: loop body
LE: loop exit
PB: predicated region body
PF: predicated region fallthrough
CT: control target
= control target key end

     0   :  { %s1598_s0 = inlined_call_operand.hbm [shape: bf16[2,8,160], index: 0, kind: input, shape index: {}]   ;;  %s1599_s1 = inlined_call_operand.hbm [shape: bf16[2,8,160], index: 1, kind: input, shape index: {}]   ;;  %s1600_s2 = inlined_call_operand.hbm [shape: bf16[32,33], index: 2, kind: input, shape index: {}]   ;;  %s1601_s3 = inlined_call_operand.hbm [shape: bf16[2,16,160], index: 3, kind: output, shape index: {0}]   ;;  %s1602_s4 = inlined_call_operand.hbm [shape: bf16[2,8,160], index: 4, kind: output, shape index: {1}]   ;;  %s1603_s5 = inlined_call_operand.hbm [shape: bf16[2,8,160], index: 5, kind: output, shape index: {2}]  }
   0x1   :  { %1615 = sst [smem:[#allocation23_spill]] %s1600_s2 }
   0x2   :  { %1616 = sst [smem:[#allocation24_spill]] %s1601_s3 }
   0x3   :  { %1617 = sst [smem:[#allocation25_spill]] %s1603_s5 }
   0x4   :  { %11 = vsyncpa [#allocation5], 0 }
   0x5   :  { %13 = vsyncpa [#allocation5 + $0x1], 0 }
   0x6   :  { %14 = vsyncpa [#allocation8], 0 }
   0x7   :  { %16 = vsyncpa [#allocation8 + $0x1], 0 }
   0x8   :  { %17 = vsyncpa [#allocation6], 0 }
   0x9   :  { %19 = vsyncpa [#allocation6 + $0x1], 0 }
   0xa   :  { %20 = vsyncpa [#allocation12], 0 }
   0xb   :  { %22 = vsyncpa [#allocation12 + $0x1], 0  ;;  %s1234_s18 = smov 0   ;;  %s1236_s19 = smov 0  }
   0xc   :  { %s1238_s20 = smov 0   ;;  %s1240_s21 = smov 0  }
   0xd   :  { %s1242_s22 = smov 0   ;;  %s1244_s23 = smov 0  }
   0xe   :  { %s1246_s24 = smov 0   ;;  %s1248_s25 = smov 0  }
   0xf LB: > { %1618 = sst [smem:[#allocation19_spill]] %s1158_s18  ;;  %s1275_s26 = sadd.s32 4294967295, %s1186_s25   ;;  %s1186_s25 = sphi %s1248_s25, %s28_s25   ;;  %s1182_s24 = sphi %s1246_s24, %s1650_s24   ;;  %s1178_s23 = sphi %s1244_s23, %s1649_s23   ;;  %s1174_s22 = sphi %s1242_s22, %s1648_s22   ;;  %s1170_s21 = sphi %s1240_s21, %s1647_s21   ;;  %s1166_s20 = sphi %s1238_s20, %s1646_s20   ;;  %s1162_s19 = sphi %s1236_s19, %s1645_s19   ;;  %s1158_s18 = sphi %s1234_s18, %s1644_s18  }
  0x10   : > { %s1607_s27 = sadd.s32 4294967294, %s1186_s25   ;;  %p62_p0 = scmp.ne.s32.totalorder %s1162_s19, %s1158_s18 }
  0x11   : > { %p1604_p1 = scmp.eq.s32.totalorder %s1275_s26, 0  ;;  %p143_p3 = scmp.eq.s32.totalorder %s1607_s27, 3 }
  0x12   : > { %p746_p5 = scmp.ge.s32.totalorder %s1186_s25, 1  ;;  %p206_p7 = scmp.lt.s32.totalorder %s1186_s25, 5 }
  0x13   : > { %p1286_p4 = por %p1604_p1, %p62_p0  ;;  %p1291_p6 = por %p143_p3, %p62_p0 }
  0x14   : > { %p1296_p8 = pnand %p746_p5, %p206_p7  ;;  %s1188_s6 = smov [#allocation9]  }
  0x15   : > { %s1619_s28 = scalar_select %p1286_p4, 1, 0 }
  0x16   : > { %s1620_s29 = scalar_select %p1291_p6, 1, 0 }
  0x17   : > { %s1622_s30 = scalar_select %p1296_p8, 1, 0 }
  0x18   : > { %1621 = sst [smem:[#allocation20_spill]] %s1620_s29  ;;  %s218_s7 = sshll.u32 %s1188_s6, 4  ;;  %s219_s7 = int_to_ptr.vmem [resolvable:$true] %s218_s7 }
  0x19   : > { %p819_p9 = pneg %p1296_p8  ;;  %s1624_s2 = sld [smem:[#allocation23_spill]] }
  0x1b   : > { %p1304_p10 = pnand %p819_p9, %p1604_p1 }
  0x1d   : > { %p934_p12 = pneg %p1304_p10 }
  0x1f   : > { %s932_s11 = scalar_lea.hbm %s1624_s2, 256 }
  0x20   : > { %p933_p11 = scmp.ne.s32.totalorder %s1624_s2, %s932_s11  ;;  %p939_p3 = scmp.lt.u32.totalorder %s932_s11, %s1624_s2 }
  0x22   : > { %p935_p13 = pnand %p934_p12, %p933_p11 }
  0x24   : > { %p936_p0 = pneg %p935_p13 }
  0x26   : > { %p941_p5 = pnand %p939_p3, %p936_p0 }
  0x28   : > { %944 = shalt.err (!%p941_p5)
}
  0x29   : > { %s945_s16 = scalar_lea.vmem %s219_s7, 256  ;;  %p953_p2 = scmp.lt.s32.totalorder %s219_s7, %s219_s7 }
  0x2a   : > { %p946_p7 = scmp.ne.s32.totalorder %s219_s7, %s945_s16  ;;  %p954_p6 = scmp.lt.s32.totalorder %s945_s16, %s945_s16 }
  0x2c   : > { %p948_p9 = pnand %p946_p7, %p934_p12  ;;  %p955_p4 = por %p954_p6, %p953_p2 }
  0x2e   : > { %p949_p1 = pneg %p948_p9 }
  0x30   : > { %p956_p8 = pnand %p955_p4, %p949_p1 }
  0x32   : > { %959 = shalt.err (!%p956_p8)
}
  0x33   : > { %s1189_s17 = smov 64   ;;  %s1190_s6 = smov 4  }
  0x34   : > { %822 = dma.hbm_to_vmem [thread:$0]  (!%p1304_p10), %s1624_s2, 256, %s219_s7, [#allocation8], %s1189_s17, %s1189_s17, %s1190_s6  }
  0x35   : > { %s37_s11 = sadd.s32 1, %s1178_s23  ;;  %s40_s12 = sadd.s32 1, %s1182_s24 }
  0x36   : > { %p38_p1 = scmp.ge.s32.totalorder %s37_s11, 2  ;;  %s49_s13 = sadd.s32 1, %s1166_s20 }
  0x37   : > { %p56_p2 = scmp.ne.s32.totalorder %s1166_s20, %s1162_s19  ;;  %p57_p4 = scmp.eq.s32.totalorder %s1186_s25, 0 }
  0x38   : > { %s1652_s11 = smov (%p38_p1, %s37_s11), 0  ;;  %s1654_s12 = smov (!%p38_p1, %s40_s12), %s1182_s24 }
  0x39   : > { %1625 = sst [smem:[#allocation21_spill]] %s1652_s11  ;;  %s45_s14 = ssub.s32 %s1178_s23, %s1652_s11 }
  0x3a   : > { %p42_p6 = scmp.ge.s32.totalorder %s1654_s12, 2  ;;  %p1626_p8 = scmp.eq.s32.totalorder %s1275_s26, 3 }
  0x3b   : > { %p1341_p10 = por %p57_p4, %p56_p2  ;;  %p841_p12 = scmp.lt.s32.totalorder %s1186_s25, 4 }
  0x3c   : > { %p1337_p11 = por %p1626_p8, %p56_p2  ;;  %s1656_s12 = smov (%p42_p6, %s1654_s12), 0 }
  0x3d   : > { %1629 = sst [smem:[#allocation22_spill]] %s1656_s12  ;;  %s232_s15 = sand.u32 1, %s1166_s20  }
  0x3e   : > { %s1627_s8 = scalar_select %p1337_p11, 1, 0 }
  0x3f   : > { %s750_s16 = sshll.u32 %s1182_s24, 1  ;;  %s44_s17 = ssub.s32 %s1182_s24, %s1656_s12 }
  0x40   : > { %s46_s6 = sor.u32 %s45_s14, %s44_s17  ;;  %s1352_s9 = sshll.u32 %s232_s15, 2 }
  0x41   : > { %p47_p13 = scmp.eq.s32.totalorder %s46_s6, 0  ;;  %s241_s10 = sadd.s32 %s1178_s23, %s750_s16 }
  0x42   : > { %s236_s27 = scalar_lea.vmem [#allocation4], %s1352_s9  ;;  %s751_s29 = sshll.u32 %s241_s10, 6 }
  0x43   : > { %s245_s2 = sshll.u32 %s236_s27, 4  ;;  %s1364_s5 = scalar_lea.hbm %s1598_s0, %s751_s29  ;;  %s1359_s2 = int_to_ptr.vmem [resolvable:$true] %s245_s2 }
  0x44   : > { %s1357_s11 = scalar_select %p47_p13, %s1166_s20, %s49_s13  }
  0x45   : > { %p1370_p0 = pnand %p841_p12, %p1341_p10  ;;  %s1377_s16 = scalar_lea.hbm %s1599_s1, %s751_s29 }
  0x46   : > { %s252_s3 = sand.u32 1, %s1186_s25   ;;  %s233_s18 = scalar_lea.sflag [#allocation5], %s232_s15 }
  0x47   : > { %s960_s17 = scalar_lea.hbm %s1364_s5, 64  ;;  %p962_p5 = pneg %p1370_p0 }
  0x48   : > { %p961_p3 = scmp.ne.s32.totalorder %s1364_s5, %s960_s17  ;;  %s965_s10 = scalar_lea.hbm %s1598_s0, 256 }
  0x49   : > { %p966_p1 = scmp.lt.u32.totalorder %s1364_s5, %s1598_s0  ;;  %p967_p2 = scmp.lt.u32.totalorder %s965_s10, %s960_s17 }
  0x4a   : > { %p963_p7 = pnand %p962_p5, %p961_p3  ;;  %p969_p6 = scmp.lt.u32.totalorder %s960_s17, %s1364_s5 }
  0x4b   : > { %p968_p4 = por %p967_p2, %p966_p1 }
  0x4c   : > { %p964_p9 = pneg %p963_p7 }
  0x4d   : > { %p970_p8 = por %p969_p6, %p968_p4 }
  0x4f   : > { %p971_p10 = pnand %p970_p8, %p964_p9 }
  0x51   : > { %974 = shalt.err (!%p971_p10)
}
  0x52   : > { %s975_s29 = scalar_lea.vmem %s1359_s2, 64  ;;  %s1191_s15 = smov [#allocation4]  }
  0x53   : > { %p976_p12 = scmp.ne.s32.totalorder %s1359_s2, %s975_s29  ;;  %s980_s13 = sshll.u32 %s1191_s15, 4  ;;  %s981_s13 = int_to_ptr.vmem [resolvable:$false] %s980_s13 }
  0x54   : > { %s982_s12 = scalar_lea.vmem %s981_s13, 128  ;;  %p983_p7 = scmp.lt.s32.totalorder %s1359_s2, %s981_s13 }
  0x55   : > { %p978_p13 = pnand %p976_p12, %p962_p5  ;;  %p984_p1 = scmp.lt.s32.totalorder %s982_s12, %s975_s29 }
  0x57   : > { %p979_p3 = pneg %p978_p13  ;;  %p985_p2 = por %p984_p1, %p983_p7 }
  0x59   : > { %p986_p4 = pnand %p985_p2, %p979_p3 }
  0x5b   : > { %989 = shalt.err (!%p986_p4)
}
  0x5c   : > { %826 = dma.hbm_to_vmem [thread:$0]  (!%p1370_p0), %s1364_s5, 64, %s1359_s2, %s233_s18  }
  0x5d   : > { %s256_s17 = scalar_lea.vmem [#allocation7], %s1352_s9  ;;  %s253_s6 = scalar_lea.sflag [#allocation8], %s252_s3 }
  0x5e   : > { %s265_s7 = sshll.u32 %s256_s17, 4  ;;  %s990_s10 = scalar_lea.hbm %s1377_s16, 64  ;;  %s266_s7 = int_to_ptr.vmem [resolvable:$true] %s265_s7 }
  0x5f   : > { %p991_p9 = scmp.ne.s32.totalorder %s1377_s16, %s990_s10  ;;  %s995_s15 = scalar_lea.hbm %s1599_s1, 256 }
  0x60   : > { %p996_p10 = scmp.lt.u32.totalorder %s1377_s16, %s1599_s1  ;;  %p997_p12 = scmp.lt.u32.totalorder %s995_s15, %s990_s10 }
  0x61   : > { %p993_p6 = pnand %p991_p9, %p962_p5  ;;  %p999_p3 = scmp.lt.u32.totalorder %s990_s10, %s1377_s16 }
  0x62   : > { %p998_p13 = por %p997_p12, %p996_p10 }
  0x63   : > { %p994_p8 = pneg %p993_p6 }
  0x64   : > { %p1000_p7 = por %p999_p3, %p998_p13 }
  0x66   : > { %p1001_p1 = pnand %p1000_p7, %p994_p8 }
  0x68   : > { %1004 = shalt.err (!%p1001_p1)
}
  0x69   : > { %s1005_s2 = scalar_lea.vmem %s266_s7, 64  ;;  %s1192_s5 = smov [#allocation7]  }
  0x6a   : > { %p1006_p2 = scmp.ne.s32.totalorder %s266_s7, %s1005_s2  ;;  %s1010_s9 = sshll.u32 %s1192_s5, 4  ;;  %s1011_s9 = int_to_ptr.vmem [resolvable:$false] %s1010_s9 }
  0x6b   : > { %s1012_s3 = scalar_lea.vmem %s1011_s9, 128  ;;  %p1013_p6 = scmp.lt.s32.totalorder %s266_s7, %s1011_s9 }
  0x6c   : > { %p1008_p4 = pnand %p1006_p2, %p962_p5  ;;  %p1014_p11 = scmp.lt.s32.totalorder %s1012_s3, %s1005_s2 }
  0x6e   : > { %p1009_p9 = pneg %p1008_p4  ;;  %p1015_p10 = por %p1014_p11, %p1013_p6 }
  0x70   : > { %p1016_p12 = pnand %p1015_p10, %p1009_p9 }
  0x72   : > { %1019 = shalt.err (!%p1016_p12)
}
  0x73   : > { %829 = dma.hbm_to_vmem [thread:$0]  (!%p1370_p0), %s1377_s16, 64, %s266_s7, %s253_s6  }
  0x74   : > { %p1631_p8 = scmp.ne.s32.totalorder %s1622_s30, 0 }
  0x75   : > { %s1430_s18 = sand.u32 (!%p1631_p8), 1, %s1162_s19   ;;  %p1632_p11 = scmp.ne.s32.totalorder (!%p1631_p8), %s1619_s28, 0 }
  0x76   : > { %274 = sbr.rel (%p1631_p8) target bundleno = 589 (0x24d), region = 32  ;;  %s1433_s17 = sshll.u32 (!%p1631_p8), %s1430_s18, 2 }
  0x77   : > { %s277_s10 = scalar_lea.sflag (!%p1631_p8), [#allocation5], %s1430_s18  ;;  %s280_s27 = scalar_lea.vmem (!%p1631_p8), [#allocation4], %s1433_s17 }
  0x7d   : > { %1137 = dma.done.wait (%p1632_p11), %s277_s10, 64  }
  0x7e   : > { %1139 = vsyncadd (%p1632_p11), %s277_s10, 4294967232  ;;  %s285_s30 = sand.u32 1, %s1275_s26   ;;  %s289_s16 = scalar_lea.vmem [#allocation7], %s1433_s17 }
  0x7f   : > { %s286_s14 = scalar_lea.sflag [#allocation8], %s285_s30 }
  0x80   : > { %1141 = dma.done.wait (%p1632_p11), %s286_s14, 64  }
  0x81   : > { %1143 = vsyncadd (%p1632_p11), %s286_s14, 4294967232  ;;  %p1633_p0 = scmp.eq.s32.totalorder %s1275_s26, 0 }
  0x83   : > { %1145 = dma.done.wait (%p1633_p0), [#allocation8], 256   ;;  %p1634_p5 = pmov %p1633_p0 }
  0x84   : > { %s759_s7 = sshll.u32 %s1430_s18, 3  ;;  %s327_s29 = scalar_lea.vmem [#allocation11], %s1433_s17 }
  0x85   : > { %1147 = vsyncadd (%p1634_p5), [#allocation8], 4294967040  ;;  %s1454_s6 = scalar_lea.vmem [#allocation10], %s759_s7  ;;  %s334_s15 = scalar_lea.vmem [#allocation13], %s1433_s17 }
  0x86   : > { %p762_p13 = scmp.ne.s32.totalorder %s1170_s21, 0 }
  0x87   : > { %vm341_vm0 = vcmask (!%p762_p13), 11264   ;;  %vm343_vm1 = vcmask (!%p762_p13), 1040384   ;;  %vm344_vm2 = vsmask.f32 (!%p762_p13), 256  ;;  %v1193_v0 = vmov (!%p762_p13), 0  }
  0x88   : > { %340 = sbr.rel (%p762_p13) target bundleno = 143 (0x8f), region = 48  ;;  %342 = vst.msk [vmem:[#allocation2] sm:$0xf] (!%p762_p13), %vm341_vm0, %v1193_v0  ;;  %vm345_vm3 = vmand (!%p762_p13), %vm343_vm1, %vm344_vm2  ;;  %v346_v1 = vld [vmem:[#allocation3 + $0x10] sm:$0x1] (!%p762_p13) }
  0x89   : > { %v347_v2 = vsel (!%p762_p13), %vm345_vm3, 1065369472, %v346_v1 }
  0x8a   : > { %348 = vst [vmem:[#allocation3 + $0x10] sm:$0x1] (!%p762_p13), %v347_v2 }
  0x8f PF: > { %v349_v3 = vld [vmem:[%s280_s27] sm:$0xf]  ;;  %v350_v4 = vld [vmem:[#allocation2] sm:$0xf]  ;;  %s1194_s28 = smov 2   ;;  %s1195_s13 = smov 127  }
  0x90   : > { %352 = vrot.lane.b32.xlu0 %v349_v3, %s1194_s28  ;;  %370 = vst [vmem:[#allocation3 + $0x8] sm:$0xf] %v349_v3  ;;  %365 = vrot.lane.b32.xlu1 %v350_v4, %s1195_s13  ;;  %v371_v5 = vld [vmem:[%s289_s16] sm:$0xf]  ;;  %s1196_s12 = smov 1   ;;  %v922_v6 = vld [vmem:[#allocation9] sm:$0xff]  }
  0x91   : > { %372 = vst [vmem:[#allocation3 + $0xc] sm:$0xf] %v371_v5  ;;  %vm408_vm4 = vcmask 269312   ;;  %vm355_vm5 = vcmask 1043472   ;;  %vm357_vm6 = vcmask 11264   ;;  %vm362_vm7 = vcmask 1043464  }
  0x92   : > { %801 = vmatprep.mubr.msk.bf16.mxu0 %vm408_vm4, %v922_v6  ;;  %vm368_vm8 = vcmask 3072   ;;  %vm415_vm9 = vcmask 1040384   ;;  %v921_v10 = vld [vmem:[#allocation3 + $0x10] ss:$0 sps:$4 sm:$0x11]   ;;  %v1197_v13 = vmov 0  }
  0x93   : > { %v417_v14 = vsel %vm415_vm9, 65535, %v1197_v13  ;;  %v923_v16 = vld [vmem:[#allocation9 + $0x8] sm:$0xff]   ;;  %s777_s2 = sshll.u32 %s1174_s22, 1  ;;  %s545_s3 = sshll.u32 %s327_s29, 4  ;;  %s1472_s3 = int_to_ptr.vmem [resolvable:$true] %s545_s3 }
  0x94   : > { %359 = vrot.lane.b32.xlu0 %v349_v3, %s1196_s12  ;;  %v419_v15 = vand.u32 %v921_v10, %v417_v14  ;;  %s541_s5 = sadd.s32 %s1170_s21, %s777_s2  ;;  %s560_s10 = sshll.u32 %s334_s15, 4  ;;  %s1481_s10 = int_to_ptr.vmem [resolvable:$true] %s560_s10 }
  0x95   : > { %s778_s9 = sshll.u32 %s541_s5, 6  ;;  %s1635_s13 = sld [smem:[#allocation25_spill]] }
  0x96   : > { %s1470_s16 = scalar_lea.hbm %s1602_s4, %s778_s9  ;;  %s1485_s2 = scalar_lea.sflag [#allocation12], %s285_s30 }
  0x97   : > { %s1020_s5 = scalar_lea.vmem %s1472_s3, 64  ;;  %p1636_p7 = scmp.ne.s32.totalorder %s1627_s8, 0 }
  0x98   : > { %v920_v12 = vld [vmem:[#allocation3 + $0x8] sm:$0xff]   ;;  %p1021_p3 = scmp.ne.s32.totalorder %s1472_s3, %s1020_s5 }
  0x9a   : > { %p1022_p1 = pnand %p1021_p3, %p1636_p7 }
  0x9b   : > { %s1479_s12 = scalar_lea.hbm %s1635_s13, %s778_s9 }
  0x9c   : > { %p1023_p2 = pneg %p1022_p1 }
 0x102   : > { %v353_v7 = vpop.permute.xlu0 %352  ;;  %v366_v8 = vpop.permute.xlu1 %365 }
 0x103   : > { %356 = vst.msk [vmem:[#allocation3] sm:$0xf] %vm355_vm5, %v353_v7 }
 0x104   : > { %373 = vst.msk [vmem:[#allocation2] sm:$0xf] %vm357_vm6, %v353_v7  ;;  %358 = vst.msk [vmem:[#allocation3] sm:$0xf] %vm357_vm6, %v350_v4 }
 0x106   : > { %v360_v9 = vpop.permute.xlu0 %359 }
 0x107   : > { %363 = vst.msk [vmem:[#allocation3 + $0x4] sm:$0xf] %vm362_vm7, %v360_v9 }
 0x108   : > { %369 = vst.msk [vmem:[#allocation3 + $0x4] sm:$0xf] %vm368_vm8, %v366_v8 }
 0x10f   : > { %v919_v11 = vld [vmem:[#allocation3] sm:$0xff]  }
 0x110   : > { %795 = vmatprep.subr.bf16.mxu0 %v919_v11 }
 0x111   : > { %796 = vmatpush3.bf16.msra.mxu0 %v919_v11 }
 0x112   : > { %797 = vmatprep.subr.bf16.mxu0 %v920_v12 }
 0x115   : > { %798 = vmatpush3.bf16.msra.mxu0 %v920_v12 }
 0x116   : > { %799 = vmatprep.subr.bf16.mxu0 %v419_v15 }
 0x119   : > { %800 = vmatpush3.bf16.msra.mxu0 %v419_v15 }
 0x11c   : > { %802 = vmatmul.mubr.msk.bf16.vlgmr.msra.gmra.mrb[0].mxu0 %vm408_vm4, %v923_v16 }
 0x1ef   : > { %v803_v17 = vpop.f32.mrb[0].mxu0 }
 0x1f0   : > { %v498_v18 = vpack.c.bf16 %v803_v17, %v803_v17  ;;  %v455_v19 = vpop.f32.mrb[1].mxu0 }
 0x1f1   : > { %v470_v20 = vmax.f32 %v455_v19, -30.0  ;;  %v804_v21 = vpop.f32.mrb[2].mxu0 }
 0x1f2   : > { %499 = vst [vmem:[%s327_s29] sm:$0xf] %v498_v18  ;;  %v500_v22 = vpack.c.bf16 %v804_v21, %v804_v21  ;;  %v458_v23 = vpop.f32.mrb[3].mxu0  ;;  %s1198_s29 = smov [#allocation11]  }
 0x1f3   : > { %v472_v24 = vsub.f32 0.0, %v470_v20  ;;  %v471_v25 = vmax.f32 %v458_v23, -30.0  ;;  %s1024_s27 = sshll.u32 %s1198_s29, 4  ;;  %s1025_s27 = int_to_ptr.vmem [resolvable:$false] %s1024_s27 }
 0x1f4   : > { %s1026_s14 = scalar_lea.vmem %s1025_s27, 128  ;;  %p1027_p4 = scmp.lt.s32.totalorder %s1472_s3, %s1025_s27 }
 0x1f5   : > { %p1028_p9 = scmp.lt.s32.totalorder %s1026_s14, %s1020_s5 }
 0x1f7   : > { %p1029_p6 = por %p1028_p9, %p1027_p4 }
 0x1f9   : > { %p1030_p10 = pnand %p1029_p6, %p1023_p2 }
 0x1fb   : > { %1033 = shalt.err (!%p1030_p10)
}
 0x1fc   : > { %s1034_s26 = scalar_lea.hbm %s1470_s16, 64  ;;  %s1038_s7 = scalar_lea.hbm %s1602_s4, 256 }
 0x1fd   : > { %p1035_p12 = scmp.ne.s32.totalorder %s1470_s16, %s1034_s26  ;;  %p1039_p0 = scmp.lt.u32.totalorder %s1470_s16, %s1602_s4 }
 0x1fe   : > { %p1040_p5 = scmp.lt.u32.totalorder %s1038_s7, %s1034_s26  ;;  %p1042_p3 = scmp.lt.u32.totalorder %s1034_s26, %s1470_s16 }
 0x1ff   : > { %p1036_p8 = pnand %p1035_p12, %p1636_p7 }
 0x200   : > { %p1041_p13 = por %p1040_p5, %p1039_p0 }
 0x201   : > { %p1037_p11 = pneg %p1036_p8 }
 0x202   : > { %p1043_p1 = por %p1042_p3, %p1041_p13 }
 0x204   : > { %p1044_p2 = pnand %p1043_p1, %p1037_p11 }
 0x206   : > { %1047 = shalt.err (!%p1044_p2)
}
 0x207   : > { %814 = dma.vmem_to_hbm [thread:$0]  (%p1636_p7), %s1472_s3, 64, %s1470_s16, %s1485_s2   ;;  %501 = vst [vmem:[%s334_s15] sm:$0xf] %v500_v22  ;;  %v474_v26 = vmul.f32 1.442695, %v472_v24  ;;  %v473_v27 = vsub.f32 0.0, %v471_v25 }
 0x208   : > { %s1048_s5 = scalar_lea.vmem %s1481_s10, 64  ;;  %s1199_s27 = smov [#allocation13]  }
 0x209   : > { %p1049_p4 = scmp.ne.s32.totalorder %s1481_s10, %s1048_s5  ;;  %s1052_s14 = sshll.u32 %s1199_s27, 4  ;;  %s1053_s14 = int_to_ptr.vmem [resolvable:$false] %s1052_s14 }
 0x20a   : > { %s1054_s26 = scalar_lea.vmem %s1053_s14, 128  ;;  %p1055_p10 = scmp.lt.s32.totalorder %s1481_s10, %s1053_s14 }
 0x20b   : > { %p1050_p9 = pnand %p1049_p4, %p1636_p7  ;;  %p1056_p12 = scmp.lt.s32.totalorder %s1054_s26, %s1048_s5 }
 0x20d   : > { %p1051_p6 = pneg %p1050_p9  ;;  %p1057_p8 = por %p1056_p12, %p1055_p10 }
 0x20f   : > { %p1058_p11 = pnand %p1057_p8, %p1051_p6 }
 0x211   : > { %1061 = shalt.err (!%p1058_p11)
}
 0x212   : > { %s1062_s17 = scalar_lea.hbm %s1479_s12, 64  ;;  %s1066_s16 = scalar_lea.hbm %s1635_s13, 256 }
 0x213   : > { %p1063_p0 = scmp.ne.s32.totalorder %s1479_s12, %s1062_s17  ;;  %p1067_p3 = scmp.lt.u32.totalorder %s1479_s12, %s1635_s13 }
 0x214   : > { %p1068_p1 = scmp.lt.u32.totalorder %s1066_s16, %s1062_s17  ;;  %p1070_p4 = scmp.lt.u32.totalorder %s1062_s17, %s1479_s12 }
 0x215   : > { %p1064_p5 = pnand %p1063_p0, %p1636_p7 }
 0x216   : > { %p1069_p2 = por %p1068_p1, %p1067_p3 }
 0x217   : > { %p1065_p13 = pneg %p1064_p5 }
 0x218   : > { %p1071_p9 = por %p1070_p4, %p1069_p2 }
 0x21a   : > { %p1072_p6 = pnand %p1071_p9, %p1065_p13 }
 0x21c   : > { %1075 = shalt.err (!%p1072_p6)
}
 0x21d   : > { %815 = dma.vmem_to_hbm [thread:$0]  (%p1636_p7), %s1481_s10, 64, %s1479_s12, %s1485_s2   ;;  %924 = vpow2.f32 %v474_v26  ;;  %v476_v28 = vmul.f32 1.442695, %v473_v27 }
 0x21e   : > { %s775_s7 = sshll.u32 %s1174_s22, 2  ;;  %s527_s10 = sshll.u32 %s1454_s6, 4  ;;  %s1541_s10 = int_to_ptr.vmem [resolvable:$true] %s527_s10 }
 0x21f   : > { %926 = vpow2.f32 %v476_v28  ;;  %s524_s28 = sadd.s32 %s1170_s21, %s775_s7  ;;  %s1637_s5 = sld [smem:[#allocation24_spill]] }
 0x220   : > { %s776_s29 = sshll.u32 %s524_s28, 6  ;;  %s503_s21 = scalar_lea.sflag [#allocation6], %s1430_s18 }
 0x221   : > { %s1076_s22 = scalar_lea.vmem %s1541_s10, 128  ;;  %s1200_s14 = smov [#allocation10]  }
 0x222   : > { %p1077_p10 = scmp.ne.s32.totalorder %s1541_s10, %s1076_s22  ;;  %s1080_s26 = sshll.u32 %s1200_s14, 4  ;;  %s1081_s26 = int_to_ptr.vmem [resolvable:$false] %s1080_s26 }
 0x223   : > { %s1082_s17 = scalar_lea.vmem %s1081_s26, 256  ;;  %p1083_p11 = scmp.lt.s32.totalorder %s1541_s10, %s1081_s26 }
 0x224   : > { %p1078_p12 = pnand %p1077_p10, %p1636_p7  ;;  %p1084_p0 = scmp.lt.s32.totalorder %s1082_s17, %s1076_s22 }
 0x225   : > { %s1539_s27 = scalar_lea.hbm %s1637_s5, %s776_s29 }
 0x226   : > { %p1079_p8 = pneg %p1078_p12  ;;  %p1085_p5 = por %p1084_p0, %p1083_p11 }
 0x227   : > { %v925_v29 = vpop.eup %924 }
 0x228   : > { %v480_v30 = vmul.f32 %v925_v29, %v925_v29  ;;  %v478_v36 = vsub.f32 1.0, %v925_v29  ;;  %p1086_p13 = pnand %p1085_p5, %p1079_p8 }
 0x229   : > { %v927_v31 = vpop.eup %926 }
 0x22a   : > { %v482_v32 = vadd.f32 1.0, %v480_v30  ;;  %v481_v33 = vmul.f32 %v927_v31, %v927_v31  ;;  %v479_v37 = vsub.f32 1.0, %v927_v31 }
 0x22c   : > { %928 = vrcp.f32 %v482_v32  ;;  %v483_v34 = vadd.f32 1.0, %v481_v33 }
 0x22e   : > { %930 = vrcp.f32 %v483_v34 }
 0x236   : > { %v929_v35 = vpop.eup %928 }
 0x237   : > { %v486_v39 = vmul.f32 %v929_v35, %v478_v36 }
 0x238   : > { %v931_v38 = vpop.eup %930 }
 0x239   : > { %v487_v40 = vmul.f32 %v931_v38, %v479_v37 }
 0x23b   : > { %v788_v41 = vpack.c.bf16 %v487_v40, %v486_v39 }
 0x23d   : > { %789 = vst [vmem:[%s1454_s6] sm:$0xff] %v788_v41  }
 0x23e   : > { %1089 = shalt.err (!%p1086_p13)
}
 0x23f   : > { %s1090_s6 = scalar_lea.hbm %s1539_s27, 128  ;;  %s1094_s16 = scalar_lea.hbm %s1637_s5, 512 }
 0x240   : > { %p1091_p3 = scmp.ne.s32.totalorder %s1539_s27, %s1090_s6  ;;  %p1095_p4 = scmp.lt.u32.totalorder %s1539_s27, %s1637_s5 }
 0x241   : > { %p1096_p9 = scmp.lt.u32.totalorder %s1094_s16, %s1090_s6  ;;  %p1098_p10 = scmp.lt.u32.totalorder %s1090_s6, %s1539_s27 }
 0x242   : > { %p1092_p1 = pnand %p1091_p3, %p1636_p7 }
 0x243   : > { %p1097_p6 = por %p1096_p9, %p1095_p4 }
 0x244   : > { %p1093_p2 = pneg %p1092_p1 }
 0x245   : > { %p1099_p12 = por %p1098_p10, %p1097_p6 }
 0x247   : > { %p1100_p8 = pnand %p1099_p12, %p1093_p2 }
 0x249   : > { %1103 = shalt.err (!%p1100_p8)
}
 0x24a   : > { %s1201_s7 = smov 64   ;;  %s1202_s28 = smov 128  }
 0x24b   : > { %s1203_s29 = smov 4  }
 0x24c   : > { %813 = dma.vmem_to_hbm [thread:$0]  (%p1636_p7), %s1541_s10, 128, %s1539_s27, %s503_s21, %s1201_s7, %s1202_s28, %s1203_s29  }
 0x24d PF: > { %s1638_s12 = sld [smem:[#allocation19_spill]]  ;;  %s1639_s2 = sld [smem:[#allocation20_spill]] }
 0x24e   : > { %p843_p11 = scmp.ge.s32.totalorder %s1186_s25, 2 }
 0x253   : > { %s572_s22 = sand.u32 1, %s1638_s12   ;;  %p1640_p0 = scmp.ne.s32.totalorder %s1639_s2, 0 }
 0x254   : > { %s573_s14 = scalar_lea.sflag [#allocation6], %s572_s22 }
 0x255   : > { %p831_p5 = pnand %p843_p11, %p1640_p0 }
 0x257   : > { %1149 = dma.done.wait (!%p831_p5), %s573_s14, 128  }
 0x258   : > { %1151 = vsyncadd (!%p831_p5), %s573_s14, 4294967168  ;;  %s1641_s26 = sadd.s32 4294967294, %s1186_s25  }
 0x259   : > { %s581_s17 = sand.u32 1, %s1641_s26  }
 0x25a   : > { %s582_s6 = scalar_lea.sflag [#allocation12], %s581_s17 }
 0x25b   : > { %1153 = dma.done.wait (!%p831_p5), %s582_s6, 128  }
 0x25c   : > { %1155 = vsyncadd (!%p831_p5), %s582_s6, 4294967168  ;;  %s28_s25 = sadd.s32 1, %s1186_s25   ;;  %s1642_s8 = sld [smem:[#allocation21_spill]] }
 0x25d   : > { %p25_p7 = scmp.ge.s32.totalorder %s28_s25, 6   ;;  %s1643_s10 = sld [smem:[#allocation22_spill]] }
 0x25e   : > { %s1644_s18 = smov %s1162_s19  ;;  %s1645_s19 = smov %s1166_s20 }
 0x25f   : > { %s1646_s20 = smov %s1357_s11  ;;  %s1647_s21 = smov %s1178_s23 }
 0x260   : > { %s1648_s22 = smov %s1182_s24  ;;  %27 = sbr.rel (!%p25_p7) target bundleno = 15 (0xf), region = 130 }
 0x262   : > { %s1649_s23 = smov %s1642_s8 }
 0x263   : > { %s1650_s24 = smov %s1643_s10 }
 0x267   :  { %596 = vsyncpa [#allocation5], 1 }
 0x268   :  { %598 = vsyncpa [#allocation5 + $0x1], 1 }
 0x269   :  { %599 = vsyncpa [#allocation8], 1 }
 0x26a   :  { %601 = vsyncpa [#allocation8 + $0x1], 1 }
 0x26b   :  { %602 = vsyncpa [#allocation6], 1 }
 0x26c   :  { %604 = vsyncpa [#allocation6 + $0x1], 1 }
 0x26d   :  { %605 = vsyncpa [#allocation12], 1 }
 0x26e   :  { %607 = vsyncpa [#allocation12 + $0x1], 1 }

</bundles_post_ra>
